<compile_context>
chip_gen: v5e
topology: v5e:2x2
jax: 0.10.0
libtpu: 0.0.40
codegen_flags: <defaults>
</compile_context>

<pallas_src>
import numpy as np
import jax
import jax.numpy as jnp
from jax import lax
from jax.experimental import pallas as pl
from jax.experimental.pallas import tpu as pltpu

# ----------------------------- configuration (small shapes) ------------------
IN_CHANS = 3
EMBED_DIM = 64          # scaled down from 512
NUM_HEADS = 4
HEAD_DIM = EMBED_DIM // NUM_HEADS
DEPTH = 1               # -> layer_names = ['self', 'cross'] * DEPTH
LAYER_NAMES = ['self', 'cross'] * DEPTH

IMG_H, IMG_W = 32, 52   # PatchEmbed conv: kernel (16,26), stride (8,13)
PATCH_KH, PATCH_KW = 16, 26
PATCH_SH, PATCH_SW = 8, 13
HP = (IMG_H - PATCH_KH) // PATCH_SH + 1   # 3
WP = (IMG_W - PATCH_KW) // PATCH_SW + 1   # 3
N_PATCHES = HP * WP                       # 9   (stands in for 3969)

TARGET_PH, TARGET_PW = 8, 16              # scaled down from (32, 64)
TARGET_PATCH_DIM = IN_CHANS * TARGET_PH * TARGET_PW   # 384

VOCAB = 6624
IMG_SIZE = (IMG_H, IMG_W)                 # SegHead final size (scaled from (512,832))

LN_EPS = 1e-5
ATTN_EPS = 1e-6


# ----------------------------- in-kernel helpers ------------------------------
def _mxu(a, b):
    """MXU matmul: bf16 operands, f32 accumulation."""
    return jnp.dot(a.astype(jnp.bfloat16), b.astype(jnp.bfloat16),
                   preferred_element_type=jnp.float32)


def _layernorm(x, g, b):
    mu = jnp.mean(x, axis=-1, keepdims=True)
    xc = x - mu
    var = jnp.mean(xc * xc, axis=-1, keepdims=True)
    return xc * lax.rsqrt(var + LN_EPS) * g + b


def _elu1(x):
    # elu(x) + 1  ==  x + 1 (x > 0)  |  exp(x) (x <= 0); exp arg clamped for safety.
    return jnp.where(x > 0, x + 1.0, jnp.exp(jnp.minimum(x, 0.0)))


# ----------------------------- fused encoder layer kernel ---------------------
def _encoder_layer_kernel(x_ref, s_ref, qkv_ref, merge_ref, mlp1_ref, mlp2_ref,
                          ln1g_ref, ln1b_ref, ln2g_ref, ln2b_ref, o_ref):
    C, H, D = EMBED_DIM, NUM_HEADS, HEAD_DIM
    x = x_ref[...]                               # [L, C] f32
    s = s_ref[...]                               # [S, C] f32
    s_len = s.shape[0]

    qkv_w = qkv_ref[...]                         # [C, 3C]
    q = _mxu(x, qkv_w[:, 0 * C:1 * C])           # [L, C]
    k = _mxu(s, qkv_w[:, 1 * C:2 * C])           # [S, C]
    v = _mxu(s, qkv_w[:, 2 * C:3 * C])           # [S, C]

    Qf = _elu1(q)                                # feature map (f32, VPU/EUP)
    Kf = _elu1(k)
    v = v * (1.0 / s_len)

    merge_w = merge_ref[...]                     # [C, C]
    merged = jnp.zeros_like(q)                   # [L, C] f32 accumulator

    # Heads packed along lanes; unrolled loop over lane slices (H static).
    for h in range(H):
        sl = slice(h * D, (h + 1) * D)
        Qh, Kh, Vh = Qf[:, sl], Kf[:, sl], v[:, sl]        # [L,D], [S,D], [S,D]
        KV = lax.dot_general(Kh, Vh, (((0,), (0,)), ((), ())),
                             preferred_element_type=jnp.float32)        # [D, D]
        Ksum = jnp.sum(Kh, axis=0, keepdims=True)                       # [1, D]
        denom = lax.dot_general(Qh, Ksum, (((1,), (1,)), ((), ())),
                                preferred_element_type=jnp.float32)     # [L, 1]
        Z = pl.reciprocal(denom + ATTN_EPS, approx=True)
        msg_h = jnp.dot(Qh, KV, preferred_element_type=jnp.float32) * Z * s_len
        # merge projection folded into the head loop (no lane concat needed)
        merged = merged + _mxu(msg_h, merge_w[sl, :])                   # [L, C]

    msg = _layernorm(merged, ln1g_ref[...], ln1b_ref[...])

    # mlp(cat([x, msg])) expressed as two dots on the split weight (no concat).
    mlp1_w = mlp1_ref[...]                        # [2C, 2C]
    h1 = _mxu(x, mlp1_w[:C, :]) + _mxu(msg, mlp1_w[C:, :])
    h1 = jnp.maximum(h1, 0.0)
    msg2 = _mxu(h1, mlp2_ref[...])                # [L, C]
    msg2 = _layernorm(msg2, ln2g_ref[...], ln2b_ref[...])

    o_ref[...] = x + msg2


def encoder_layer(lp, x, source):
    # x: [1, L, C], source: [1, S, C]
    L = x.shape[1]
    out = pl.pallas_call(
        _encoder_layer_kernel,
        out_shape=jax.ShapeDtypeStruct((L, EMBED_DIM), jnp.float32),
    )(x[0], source[0], lp['qkv_w'], lp['merge_w'], lp['mlp1_w'], lp['mlp2_w'],
      lp['ln1_g'], lp['ln1_b'], lp['ln2_g'], lp['ln2_b'])
    return out[None]


# ----------------------------- patch / target / boxes embeddings --------------
def _patch_embed_kernel(pmat_ref, w_ref, b_ref, g_ref, beta_ref, pos_ref, o_ref):
    y = _mxu(pmat_ref[...], w_ref[...]) + b_ref[...]     # conv-as-matmul + bias
    y = _layernorm(y, g_ref[...], beta_ref[...])         # fused LN epilogue
    o_ref[...] = y + pos_ref[...]                        # fused pos-embed add


def patch_embed(p, img):
    # img: [1, C, H, W] -> tokens [1, P, E]
    # TODO(synk): at real scale (3969 patches) replace the Python im2col below with
    # a strided-DMA gather inside the kernel (or lax.conv feeding a tiled matmul).
    patches = []
    for i in range(HP):
        for j in range(WP):
            blk = img[0, :, i * PATCH_SH:i * PATCH_SH + PATCH_KH,
                      j * PATCH_SW:j * PATCH_SW + PATCH_KW]
            patches.append(blk.reshape(-1))
    pmat = jnp.stack(patches, axis=0)                    # [P, C*kh*kw]
    y = pl.pallas_call(
        _patch_embed_kernel,
        out_shape=jax.ShapeDtypeStruct((N_PATCHES, EMBED_DIM), jnp.float32),
    )(pmat, p['patch_w'], p['patch_b'], p['patch_ln_g'], p['patch_ln_b'],
      p['pos_embed'])
    return y[None]


def _target_embed_kernel(tvec_ref, w_ref, b_ref, pos_ref, o_ref):
    y = _mxu(tvec_ref[...], w_ref[...]) + b_ref[...]     # [1, E]
    o_ref[...] = y + pos_ref[...]                        # broadcast to [TPD, E]


def target_embed(p, target):
    # rearrange 'b c h w -> b 1 (h w c)' then Linear; pos-embed broadcast add fused.
    _, C, th, tw = target.shape
    tvec = jnp.transpose(target, (0, 2, 3, 1)).reshape(1, th * tw * C)
    y = pl.pallas_call(
        _target_embed_kernel,
        out_shape=jax.ShapeDtypeStruct((TARGET_PATCH_DIM, EMBED_DIM), jnp.float32),
    )(tvec, p['tgt_w'], p['tgt_b'], p['target_pos_embed'])
    return y[None]


def _linear_bias_kernel(x_ref, w_ref, b_ref, o_ref):
    o_ref[...] = _mxu(x_ref[...], w_ref[...]) + b_ref[...]


def boxes_embed(p, boxes):
    nb = boxes.shape[0]
    y = pl.pallas_call(
        _linear_bias_kernel,
        out_shape=jax.ShapeDtypeStruct((nb, EMBED_DIM), jnp.float32),
    )(boxes, p['boxes_w'], p['boxes_b'])
    return y[None]


# ----------------------------- text embedding (LSTM, plain JAX) ---------------
def lstm_cell(x, h, c, w_ih, w_hh, b):
    gates = x @ w_ih + h @ w_hh + b
    i, f, g, o = jnp.split(gates, 4)
    i = jax.nn.sigmoid(i)
    f = jax.nn.sigmoid(f)
    g = jnp.tanh(g)
    o = jax.nn.sigmoid(o)
    c = f * c + i * g
    h = o * jnp.tanh(c)
    return h, c


def lstm_text_embedding(p, tokens, lengths):
    # TODO(synk): LSTM recurrence (pack_padded_sequence semantics) and embedding
    # gather kept in plain JAX -- sequential / gather ops, not a Pallas hot path.
    emb = p['text_emb'][tokens]                 # [B, T, E]
    outs = []
    for bi, li in enumerate(lengths):
        seq = emb[bi, :li]
        h = jnp.zeros((EMBED_DIM,), jnp.float32)
        c = jnp.zeros((EMBED_DIM,), jnp.float32)
        for t in range(li):                     # forward direction, last valid step
            h, c = lstm_cell(seq[t], h, c, p['lstm_w_ih_f'], p['lstm_w_hh_f'], p['lstm_b_f'])
        h_f = h
        h = jnp.zeros((EMBED_DIM,), jnp.float32)
        c = jnp.zeros((EMBED_DIM,), jnp.float32)
        for t in range(li - 1, -1, -1):         # backward direction, ends at t=0
            h, c = lstm_cell(seq[t], h, c, p['lstm_w_ih_r'], p['lstm_w_hh_r'], p['lstm_b_r'])
        h_r = h
        outs.append(0.5 * (h_f + h_r))          # h_last.mean(0)
    out = jnp.stack(outs, axis=0)               # [B, E]
    norm = jnp.maximum(jnp.sqrt(jnp.sum(out * out, axis=1, keepdims=True)), 1e-12)
    return out / norm                           # F.normalize(dim=1)


# ----------------------------- fused seg head ---------------------------------
def _interp_matrix(n_in, n_out):
    # bilinear, align_corners=True, as an [n_out, n_in] interpolation matrix
    W = np.zeros((n_out, n_in), dtype=np.float32)
    if n_out == 1:
        W[0, 0] = 1.0
        return W
    scale = (n_in - 1) / (n_out - 1)
    for i in range(n_out):
        src = i * scale
        lo = min(int(np.floor(src)), n_in - 1)
        hi = min(lo + 1, n_in - 1)
        frac = src - lo
        W[i, lo] += 1.0 - frac
        W[i, hi] += frac
    return W


def _resize_matT(h, w, oh, ow):
    # Flattened (row-major) bilinear resize: out_flat = x_flat @ kron(Wh, Ww).T
    M = np.kron(_interp_matrix(h, oh), _interp_matrix(w, ow))   # [oh*ow, h*w]
    return jnp.asarray(M.T)                                     # [h*w, oh*ow]


def _seg_head_kernel(tokT_ref, w0T_ref, m1_ref, m2_ref, m3_ref, m4_ref,
                     b0_ref, cw_ref, cb_ref, o_ref):
    # tokT: [E, P]; w0T: [2, E]; mN: flattened-resize matrices; b0/cw/cb in SMEM.
    tokT = tokT_ref[...]
    # conv 1x1 (E -> 2): two row-vector matmuls; channels kept as separate rows.
    x0 = _mxu(w0T_ref[0:1, :], tokT) + b0_ref[0]      # [1, P]
    x1 = _mxu(w0T_ref[1:2, :], tokT) + b0_ref[1]
    for m_ref in (m1_ref, m2_ref, m3_ref):
        m = m_ref[...]
        y0 = _mxu(x0, m)                              # bilinear resize (flattened)
        y1 = _mxu(x1, m)
        # 1x1 conv (2 -> 2) as VPU FMAs with SMEM scalar weights (no 2-wide matmul)
        x0 = cw_ref[0, 0] * y0 + cw_ref[1, 0] * y1 + cb_ref[0]
        x1 = cw_ref[0, 1] * y0 + cw_ref[1, 1] * y1 + cb_ref[1]
    m4 = m4_ref[...]
    o_ref[0:1, :] = _mxu(x0, m4)                      # lane-dense [1, 1664] stores
    o_ref[1:2, :] = _mxu(x1, m4)


def seg_head(p, tokens):
    # tokens: [P, E] image patch tokens, row-major over (h, w)
    # TODO(synk): at real 512x832 output the kron formulation does not scale; use
    # separable per-axis resizes with an in-kernel transpose and spatial tiling.
    tokT = tokens.T                                   # [E, P] (glue transpose)
    out = pl.pallas_call(
        _seg_head_kernel,
        out_shape=jax.ShapeDtypeStruct((2, IMG_SIZE[0] * IMG_SIZE[1]), jnp.float32),
        in_specs=[pl.BlockSpec(memory_space=pltpu.MemorySpace.VMEM)] * 6
                 + [pl.BlockSpec(memory_space=pltpu.MemorySpace.SMEM)] * 3,
        out_specs=pl.BlockSpec(memory_space=pltpu.MemorySpace.VMEM),
    )(tokT, p['seg_conv_wT'], p['seg_m1T'], p['seg_m2T'], p['seg_m3T'], p['seg_m4T'],
      p['seg_conv_b'], p['seg_conv1_w'], p['seg_conv1_b'])
    return out.reshape(1, 2, IMG_SIZE[0], IMG_SIZE[1])


# ----------------------------- full forward -----------------------------------
def vit_forward(p, img, img_boxes, img_texts, img_text_lengths,
                target, target_texts, target_text_lengths):
    # ---- embeddings (dropout = eval identity) ----
    img_tok = patch_embed(p, img)                                # [1, P, E] (pos fused)
    tgt = target_embed(p, target)                                # [1, TPD, E]
    boxes = boxes_embed(p, img_boxes)                            # [1, nb, E]
    img_txt = lstm_text_embedding(p, img_texts, img_text_lengths)[None]        # [1, nt, E]
    tgt_txt = lstm_text_embedding(p, target_texts, target_text_lengths)[None]  # [1, mt, E]

    img_all = jnp.concatenate([img_tok, img_txt, boxes], axis=1)
    tgt_all = jnp.concatenate([tgt, tgt_txt], axis=1)

    # ---- LoFTR transformer (one fused pallas_call per encoder layer) ----
    feat0, feat1 = tgt_all, img_all
    for lp, name in zip(p['layers'], LAYER_NAMES):
        if name == 'self':
            feat0 = encoder_layer(lp, feat0, feat0)
            feat1 = encoder_layer(lp, feat1, feat1)
        else:  # cross
            feat0 = encoder_layer(lp, feat0, feat1)
            feat1 = encoder_layer(lp, feat1, feat0)

    # ---- image features -> fused seg head (one pallas_call) ----
    x = feat1[0, :N_PATCHES, :]                                  # [P, E]
    return seg_head(p, x)


# ----------------------------- parameters ------------------------------------
def init_params(key):
    def nrm(k, shape, scale=0.02):
        return scale * jax.random.normal(k, shape, jnp.float32)

    ks = iter(jax.random.split(key, 64))
    E = EMBED_DIM
    p = {}
    p['patch_w'] = nrm(next(ks), (IN_CHANS * PATCH_KH * PATCH_KW, E))
    p['patch_b'] = nrm(next(ks), (1, E))
    p['patch_ln_g'] = jnp.ones((1, E), jnp.float32)
    p['patch_ln_b'] = jnp.zeros((1, E), jnp.float32)
    p['pos_embed'] = nrm(next(ks), (N_PATCHES, E))
    p['tgt_w'] = nrm(next(ks), (TARGET_PATCH_DIM, E))
    p['tgt_b'] = nrm(next(ks), (1, E))
    p['target_pos_embed'] = nrm(next(ks), (TARGET_PATCH_DIM, E))
    p['boxes_w'] = nrm(next(ks), (8, E))
    p['boxes_b'] = nrm(next(ks), (1, E))
    p['text_emb'] = nrm(next(ks), (VOCAB, E))
    for sfx in ('f', 'r'):
        p[f'lstm_w_ih_{sfx}'] = nrm(next(ks), (E, 4 * E))
        p[f'lstm_w_hh_{sfx}'] = nrm(next(ks), (E, 4 * E))
        p[f'lstm_b_{sfx}'] = nrm(next(ks), (4 * E,))
    layers = []
    for _ in range(2 * DEPTH):
        layers.append({
            'qkv_w': nrm(next(ks), (E, 3 * E)),      # fused q|k|v projection
            'merge_w': nrm(next(ks), (E, E)),
            'mlp1_w': nrm(next(ks), (2 * E, 2 * E)),
            'mlp2_w': nrm(next(ks), (2 * E, E)),
            'ln1_g': jnp.ones((1, E), jnp.float32),
            'ln1_b': jnp.zeros((1, E), jnp.float32),
            'ln2_g': jnp.ones((1, E), jnp.float32),
            'ln2_b': jnp.zeros((1, E), jnp.float32),
        })
    p['layers'] = layers
    # seg head: conv (E->2) stored pre-transposed; 2x2 conv weights live in SMEM
    p['seg_conv_wT'] = nrm(next(ks), (2, E))
    p['seg_conv_b'] = nrm(next(ks), (2,))
    p['seg_conv1_w'] = nrm(next(ks), (2, 2))
    p['seg_conv1_b'] = nrm(next(ks), (2,))
    # precomputed flattened bilinear (align_corners) resize matrices (constants)
    p['seg_m1T'] = _resize_matT(HP, WP, 2 * HP, 4 * WP)
    p['seg_m2T'] = _resize_matT(2 * HP, 4 * WP, 4 * HP, 8 * WP)
    p['seg_m3T'] = _resize_matT(4 * HP, 8 * WP, 8 * HP, 16 * WP)
    p['seg_m4T'] = _resize_matT(8 * HP, 16 * WP, IMG_SIZE[0], IMG_SIZE[1])
    return p


# ----------------------------- main -------------------------------------------
if __name__ == "__main__":
    key = jax.random.PRNGKey(0)
    kp, k0, k1, k2, k3, k4 = jax.random.split(key, 6)

    params = init_params(kp)

    img = jax.random.normal(k0, (1, IN_CHANS, IMG_H, IMG_W), jnp.float32)
    img_boxes = jax.random.normal(k1, (2, 8), jnp.float32)
    img_texts = jax.random.randint(k2, (2, 5), 0, VOCAB)
    img_text_lengths = [5, 3]
    target = jax.random.normal(k3, (1, IN_CHANS, TARGET_PH, TARGET_PW), jnp.float32)
    target_texts = jax.random.randint(k4, (1, 4), 0, VOCAB)
    target_text_lengths = [4]

    out = vit_forward(params, img, img_boxes, img_texts, img_text_lengths,
                      target, target_texts, target_text_lengths)
    out = jax.block_until_ready(out)
    assert out.shape == (1, 2, IMG_SIZE[0], IMG_SIZE[1]), out.shape
    assert jnp.all(jnp.isfinite(out))
    print("KERNEL_OK")
</pallas_src>

<mosaic_0001>
module attributes {stable_mosaic.version = 11 : i64} {
  func.func @_patch_embed_kernel(%arg0: memref<9x1248xf32, #tpu.memory_space<vmem>>, %arg1: memref<1248x64xf32, #tpu.memory_space<vmem>>, %arg2: memref<1x64xf32, #tpu.memory_space<vmem>>, %arg3: memref<1x64xf32, #tpu.memory_space<vmem>>, %arg4: memref<1x64xf32, #tpu.memory_space<vmem>>, %arg5: memref<9x64xf32, #tpu.memory_space<vmem>>, %arg6: memref<9x64xf32, #tpu.memory_space<vmem>>) attributes {dimension_semantics = [], scalar_prefetch = 0 : i64, scratch_operands = 0 : i64, tpu.core_type = #tpu.core_type<tc>} {
    %c0 = arith.constant 0 : index
    %c0_0 = arith.constant 0 : index
    %0 = vector.load %arg0[%c0, %c0_0] : memref<9x1248xf32, #tpu.memory_space<vmem>>, vector<9x1248xf32>
    %c0_1 = arith.constant 0 : index
    %c0_2 = arith.constant 0 : index
    %1 = vector.load %arg1[%c0_1, %c0_2] : memref<1248x64xf32, #tpu.memory_space<vmem>>, vector<1248x64xf32>
    %2 = arith.truncf %0 : vector<9x1248xf32> to vector<9x1248xbf16>
    %3 = arith.truncf %1 : vector<1248x64xf32> to vector<1248x64xbf16>
    %cst = arith.constant dense<0.000000e+00> : vector<9x64xf32>
    %4 = tpu.matmul %2, %3, %cst {dimension_numbers = #tpu.dot_dimension_numbers<[1], [0], [0], [1], [0, 0, 1, 1], [], []>} : vector<9x1248xbf16>, vector<1248x64xbf16>, vector<9x64xf32> -> vector<9x64xf32>
    %c0_3 = arith.constant 0 : index
    %c0_4 = arith.constant 0 : index
    %5 = vector.load %arg2[%c0_3, %c0_4] : memref<1x64xf32, #tpu.memory_space<vmem>>, vector<1x64xf32>
    %6 = vector.broadcast %5 : vector<1x64xf32> to vector<9x64xf32>
    %7 = arith.addf %4, %6 : vector<9x64xf32>
    %c0_5 = arith.constant 0 : index
    %c0_6 = arith.constant 0 : index
    %8 = vector.load %arg3[%c0_5, %c0_6] : memref<1x64xf32, #tpu.memory_space<vmem>>, vector<1x64xf32>
    %c0_7 = arith.constant 0 : index
    %c0_8 = arith.constant 0 : index
    %9 = vector.load %arg4[%c0_7, %c0_8] : memref<1x64xf32, #tpu.memory_space<vmem>>, vector<1x64xf32>
    %cst_9 = arith.constant dense<0.000000e+00> : vector<9xf32>
    %10 = vector.multi_reduction <add>, %7, %cst_9 [1] : vector<9x64xf32> to vector<9xf32>
    %11 = vector.shape_cast %10 : vector<9xf32> to vector<9x1xf32>
    %cst_10 = arith.constant 6.400000e+01 : f32
    %12 = vector.broadcast %cst_10 : f32 to vector<9x1xf32>
    %13 = arith.divf %11, %12 : vector<9x1xf32>
    %14 = vector.broadcast %13 : vector<9x1xf32> to vector<9x64xf32>
    %15 = arith.subf %7, %14 : vector<9x64xf32>
    %16 = arith.mulf %15, %15 : vector<9x64xf32>
    %cst_11 = arith.constant dense<0.000000e+00> : vector<9xf32>
    %17 = vector.multi_reduction <add>, %16, %cst_11 [1] : vector<9x64xf32> to vector<9xf32>
    %18 = vector.shape_cast %17 : vector<9xf32> to vector<9x1xf32>
    %cst_12 = arith.constant 6.400000e+01 : f32
    %19 = vector.broadcast %cst_12 : f32 to vector<9x1xf32>
    %20 = arith.divf %18, %19 : vector<9x1xf32>
    %cst_13 = arith.constant 9.99999974E-6 : f32
    %21 = vector.broadcast %cst_13 : f32 to vector<9x1xf32>
    %22 = arith.addf %20, %21 : vector<9x1xf32>
    %23 = math.rsqrt %22 : vector<9x1xf32>
    %24 = vector.broadcast %23 : vector<9x1xf32> to vector<9x64xf32>
    %25 = arith.mulf %15, %24 : vector<9x64xf32>
    %26 = vector.broadcast %8 : vector<1x64xf32> to vector<9x64xf32>
    %27 = arith.mulf %25, %26 : vector<9x64xf32>
    %28 = vector.broadcast %9 : vector<1x64xf32> to vector<9x64xf32>
    %29 = arith.addf %27, %28 : vector<9x64xf32>
    %c0_14 = arith.constant 0 : index
    %c0_15 = arith.constant 0 : index
    %30 = vector.load %arg5[%c0_14, %c0_15] : memref<9x64xf32, #tpu.memory_space<vmem>>, vector<9x64xf32>
    %31 = arith.addf %29, %30 : vector<9x64xf32>
    %c0_16 = arith.constant 0 : index
    %c0_17 = arith.constant 0 : index
    %32 = vector.load %arg6[%c0_16, %c0_17] : memref<9x64xf32, #tpu.memory_space<vmem>>, vector<9x64xf32>
    tpu.vector_store %arg6[%c0_16, %c0_17], %31 {strides = array<i32>} : memref<9x64xf32, #tpu.memory_space<vmem>>, vector<9x64xf32>,
    return
  }
}

</mosaic_0001>

<bundles_post_ra>
// kernel: tpu_custom_call.1
= control target key start
LH: loop header
LB: loop body
LE: loop exit
PB: predicated region body
PF: predicated region fallthrough
CT: control target
= control target key end

     0   :  { %s1157_s0 = inlined_call_operand.vmem [shape: f32[9,1248], index: 0, kind: input, shape index: {}]   ;;  %s1158_s1 = inlined_call_operand.vmem [shape: f32[1248,64], index: 1, kind: input, shape index: {}]   ;;  %s1159_s2 = inlined_call_operand.vmem [shape: f32[1,64], index: 2, kind: input, shape index: {}]   ;;  %s1160_s3 = inlined_call_operand.vmem [shape: f32[1,64], index: 3, kind: input, shape index: {}]   ;;  %s1161_s4 = inlined_call_operand.vmem [shape: f32[1,64], index: 4, kind: input, shape index: {}]   ;;  %s1162_s5 = inlined_call_operand.vmem [shape: f32[9,64], index: 5, kind: input, shape index: {}]   ;;  %s1163_s6 = inlined_call_operand.hbm [shape: f32[9,64], index: 6, kind: output, shape index: {}]  }
   0x1   :  { %v59_v0 = vld [vmem:[%s1158_s1 + $0x70] sm:$0xff]  ;;  %v60_v1 = vld [vmem:[%s1158_s1 + $0x78] sm:$0xff]  ;;  %v57_v11 = vld [vmem:[%s1158_s1 + $0x60] sm:$0xff] }
   0x2   :  { %v91_v2 = vld [vmem:[%s1158_s1 + $0x170] sm:$0xff]  ;;  %v218_v3 = vpack.c.bf16 %v60_v1, %v59_v0  ;;  %v92_v4 = vld [vmem:[%s1158_s1 + $0x178] sm:$0xff]  ;;  %v58_v13 = vld [vmem:[%s1158_s1 + $0x68] sm:$0xff] }
   0x3   :  { %v75_v5 = vld [vmem:[%s1158_s1 + $0xf0] sm:$0xff]  ;;  %v76_v6 = vld [vmem:[%s1158_s1 + $0xf8] sm:$0xff]  ;;  %v234_v7 = vpack.c.bf16 %v92_v4, %v91_v2  ;;  %v89_v14 = vld [vmem:[%s1158_s1 + $0x160] sm:$0xff]  ;;  %v217_v16 = vpack.c.bf16 %v58_v13, %v57_v11 }
   0x4   :  { %v226_v8 = vpack.c.bf16 %v76_v6, %v75_v5  ;;  %v107_v9 = vld [vmem:[%s1158_s1 + $0x1f0] sm:$0xff]  ;;  %v108_v10 = vld [vmem:[%s1158_s1 + $0x1f8] sm:$0xff]  ;;  %297 = vmatpush.bf16.msra.mxu0 %v218_v3  ;;  %v90_v15 = vld [vmem:[%s1158_s1 + $0x168] sm:$0xff] }
   0x5   :  { %v242_v12 = vpack.c.bf16 %v108_v10, %v107_v9  ;;  %325 = vmatpush.bf16.msra.mxu2 %v234_v7  ;;  %v233_v17 = vpack.c.bf16 %v90_v15, %v89_v14  ;;  %v73_v18 = vld [vmem:[%s1158_s1 + $0xe0] sm:$0xff]  ;;  %v74_v19 = vld [vmem:[%s1158_s1 + $0xe8] sm:$0xff]  ;;  %v55_v23 = vld [vmem:[%s1158_s1 + $0x50] sm:$0xff] }
   0x6   :  { %311 = vmatpush.bf16.msra.mxu1 %v226_v8  ;;  %v105_v20 = vld [vmem:[%s1158_s1 + $0x1e0] sm:$0xff]  ;;  %v225_v21 = vpack.c.bf16 %v74_v19, %v73_v18  ;;  %v106_v22 = vld [vmem:[%s1158_s1 + $0x1e8] sm:$0xff]  ;;  %v56_v24 = vld [vmem:[%s1158_s1 + $0x58] sm:$0xff] }
   0x7   :  { %339 = vmatpush.bf16.msra.mxu3 %v242_v12  ;;  %v241_v25 = vpack.c.bf16 %v106_v22, %v105_v20  ;;  %v87_v26 = vld [vmem:[%s1158_s1 + $0x150] sm:$0xff]  ;;  %v88_v27 = vld [vmem:[%s1158_s1 + $0x158] sm:$0xff]  ;;  %v216_v29 = vpack.c.bf16 %v56_v24, %v55_v23  ;;  %v53_v35 = vld [vmem:[%s1158_s1 + $0x40] sm:$0xff] }
   0x8   :  { %v71_v28 = vld [vmem:[%s1158_s1 + $0xd0] sm:$0xff]  ;;  %298 = vmatpush.bf16.msra.mxu0 %v217_v16  ;;  %v72_v30 = vld [vmem:[%s1158_s1 + $0xd8] sm:$0xff]  ;;  %v232_v33 = vpack.c.bf16 %v88_v27, %v87_v26  ;;  %v54_v36 = vld [vmem:[%s1158_s1 + $0x48] sm:$0xff] }
   0x9   :  { %v103_v31 = vld [vmem:[%s1158_s1 + $0x1d0] sm:$0xff]  ;;  %v104_v32 = vld [vmem:[%s1158_s1 + $0x1d8] sm:$0xff]  ;;  %326 = vmatpush.bf16.msra.mxu2 %v233_v17  ;;  %v224_v34 = vpack.c.bf16 %v72_v30, %v71_v28  ;;  %v85_v37 = vld [vmem:[%s1158_s1 + $0x140] sm:$0xff]  ;;  %v215_v44 = vpack.c.bf16 %v54_v36, %v53_v35 }
   0xa   :  { %312 = vmatpush.bf16.msra.mxu1 %v225_v21  ;;  %v240_v38 = vpack.c.bf16 %v104_v32, %v103_v31  ;;  %v86_v39 = vld [vmem:[%s1158_s1 + $0x148] sm:$0xff]  ;;  %v69_v40 = vld [vmem:[%s1158_s1 + $0xc0] sm:$0xff]  ;;  %v51_v47 = vld [vmem:[%s1158_s1 + $0x30] sm:$0xff] }
   0xb   :  { %340 = vmatpush.bf16.msra.mxu3 %v241_v25  ;;  %v70_v41 = vld [vmem:[%s1158_s1 + $0xc8] sm:$0xff]  ;;  %v101_v42 = vld [vmem:[%s1158_s1 + $0x1c0] sm:$0xff]  ;;  %v231_v45 = vpack.c.bf16 %v86_v39, %v85_v37  ;;  %v52_v48 = vld [vmem:[%s1158_s1 + $0x38] sm:$0xff] }
   0xc   :  { %v102_v43 = vld [vmem:[%s1158_s1 + $0x1c8] sm:$0xff]  ;;  %299 = vmatpush.bf16.msra.mxu0 %v216_v29  ;;  %v223_v46 = vpack.c.bf16 %v70_v41, %v69_v40  ;;  %v83_v49 = vld [vmem:[%s1158_s1 + $0x130] sm:$0xff]  ;;  %v84_v51 = vld [vmem:[%s1158_s1 + $0x138] sm:$0xff]  ;;  %v214_v56 = vpack.c.bf16 %v52_v48, %v51_v47 }
   0xd   :  { %327 = vmatpush.bf16.msra.mxu2 %v232_v33  ;;  %v239_v50 = vpack.c.bf16 %v102_v43, %v101_v42  ;;  %v67_v52 = vld [vmem:[%s1158_s1 + $0xb0] sm:$0xff]  ;;  %v68_v53 = vld [vmem:[%s1158_s1 + $0xb8] sm:$0xff]  ;;  %v230_v57 = vpack.c.bf16 %v84_v51, %v83_v49  ;;  %v49_v59 = vld [vmem:[%s1158_s1 + $0x20] sm:$0xff] }
   0xe   :  { %313 = vmatpush.bf16.msra.mxu1 %v224_v34  ;;  %v99_v54 = vld [vmem:[%s1158_s1 + $0x1b0] sm:$0xff]  ;;  %v100_v55 = vld [vmem:[%s1158_s1 + $0x1b8] sm:$0xff]  ;;  %v222_v58 = vpack.c.bf16 %v68_v53, %v67_v52  ;;  %v50_v60 = vld [vmem:[%s1158_s1 + $0x28] sm:$0xff] }
   0xf   :  { %341 = vmatpush.bf16.msra.mxu3 %v240_v38  ;;  %v81_v61 = vld [vmem:[%s1158_s1 + $0x120] sm:$0xff]  ;;  %v238_v62 = vpack.c.bf16 %v100_v55, %v99_v54  ;;  %v82_v63 = vld [vmem:[%s1158_s1 + $0x128] sm:$0xff]  ;;  %v213_v4 = vpack.c.bf16 %v50_v60, %v49_v59  ;;  %v47_v7 = vld [vmem:[%s1158_s1 + $0x10] sm:$0xff] }
  0x10   :  { %300 = vmatpush.bf16.msra.mxu0 %v215_v44  ;;  %v65_v0 = vld [vmem:[%s1158_s1 + $0xa0] sm:$0xff]  ;;  %v66_v1 = vld [vmem:[%s1158_s1 + $0xa8] sm:$0xff]  ;;  %v229_v5 = vpack.c.bf16 %v82_v63, %v81_v61  ;;  %v48_v8 = vld [vmem:[%s1158_s1 + $0x18] sm:$0xff] }
  0x11   :  { %328 = vmatpush.bf16.msra.mxu2 %v231_v45  ;;  %v97_v2 = vld [vmem:[%s1158_s1 + $0x1a0] sm:$0xff]  ;;  %v98_v3 = vld [vmem:[%s1158_s1 + $0x1a8] sm:$0xff]  ;;  %v221_v6 = vpack.c.bf16 %v66_v1, %v65_v0  ;;  %v79_v9 = vld [vmem:[%s1158_s1 + $0x110] sm:$0xff]  ;;  %v212_v16 = vpack.c.bf16 %v48_v8, %v47_v7 }
  0x12   :  { %314 = vmatpush.bf16.msra.mxu1 %v223_v46  ;;  %v237_v10 = vpack.c.bf16 %v98_v3, %v97_v2  ;;  %v80_v11 = vld [vmem:[%s1158_s1 + $0x118] sm:$0xff]  ;;  %v63_v12 = vld [vmem:[%s1158_s1 + $0x90] sm:$0xff]  ;;  %v45_v17 = vld [vmem:[%s1158_s1] sm:$0xff] }
  0x13   :  { %342 = vmatpush.bf16.msra.mxu3 %v239_v50  ;;  %v64_v13 = vld [vmem:[%s1158_s1 + $0x98] sm:$0xff]  ;;  %v95_v14 = vld [vmem:[%s1158_s1 + $0x190] sm:$0xff]  ;;  %v46_v18 = vld [vmem:[%s1158_s1 + $0x8] sm:$0xff]  ;;  %v228_v19 = vpack.c.bf16 %v80_v11, %v79_v9 }
  0x14   :  { %301 = vmatpush.bf16.msra.mxu0 %v214_v56  ;;  %v96_v15 = vld [vmem:[%s1158_s1 + $0x198] sm:$0xff]  ;;  %v220_v20 = vpack.c.bf16 %v64_v13, %v63_v12  ;;  %v77_v21 = vld [vmem:[%s1158_s1 + $0x100] sm:$0xff]  ;;  %v78_v22 = vld [vmem:[%s1158_s1 + $0x108] sm:$0xff]  ;;  %v211_v31 = vpack.c.bf16 %v46_v18, %v45_v17 }
  0x15   :  { %329 = vmatpush.bf16.msra.mxu2 %v230_v57  ;;  %v123_v23 = vld [vmem:[%s1158_s1 + $0x270] sm:$0xff]  ;;  %v236_v24 = vpack.c.bf16 %v96_v15, %v95_v14  ;;  %v124_v25 = vld [vmem:[%s1158_s1 + $0x278] sm:$0xff]  ;;  %v61_v28 = vld [vmem:[%s1158_s1 + $0x80] sm:$0xff]  ;;  %v227_v35 = vpack.c.bf16 %v78_v22, %v77_v21 }
  0x16   :  { %315 = vmatpush.bf16.msra.mxu1 %v222_v58  ;;  %v155_v26 = vld [vmem:[%s1158_s1 + $0x370] sm:$0xff]  ;;  %v156_v27 = vld [vmem:[%s1158_s1 + $0x378] sm:$0xff]  ;;  %v62_v29 = vld [vmem:[%s1158_s1 + $0x88] sm:$0xff]  ;;  %v250_v36 = vpack.c.bf16 %v124_v25, %v123_v23 }
  0x17   :  { %343 = vmatpush.bf16.msra.mxu3 %v238_v62  ;;  %v93_v30 = vld [vmem:[%s1158_s1 + $0x180] sm:$0xff]  ;;  %v94_v32 = vld [vmem:[%s1158_s1 + $0x188] sm:$0xff]  ;;  %v139_v33 = vld [vmem:[%s1158_s1 + $0x2f0] sm:$0xff]  ;;  %v266_v40 = vpack.c.bf16 %v156_v27, %v155_v26  ;;  %v219_v41 = vpack.c.bf16 %v62_v29, %v61_v28 }
  0x18   :  { %302 = vmatpush.bf16.msra.mxu0 %v213_v4  ;;  %v140_v34 = vld [vmem:[%s1158_s1 + $0x2f8] sm:$0xff]  ;;  %v171_v37 = vld [vmem:[%s1158_s1 + $0x3f0] sm:$0xff]  ;;  %v121_v39 = vld [vmem:[%s1158_s1 + $0x260] sm:$0xff]  ;;  %v235_v45 = vpack.c.bf16 %v94_v32, %v93_v30 }
  0x19   :  { %330 = vmatpush.bf16.msra.mxu2 %v229_v5  ;;  %v172_v38 = vld [vmem:[%s1158_s1 + $0x3f8] sm:$0xff]  ;;  %v122_v42 = vld [vmem:[%s1158_s1 + $0x268] sm:$0xff]  ;;  %v153_v43 = vld [vmem:[%s1158_s1 + $0x360] sm:$0xff]  ;;  %v258_v46 = vpack.c.bf16 %v140_v34, %v139_v33 }
  0x1a   :  { %316 = vmatpush.bf16.msra.mxu1 %v221_v6  ;;  %v154_v44 = vld [vmem:[%s1158_s1 + $0x368] sm:$0xff]  ;;  %v137_v47 = vld [vmem:[%s1158_s1 + $0x2e0] sm:$0xff]  ;;  %v274_v50 = vpack.c.bf16 %v172_v38, %v171_v37  ;;  %v119_v52 = vld [vmem:[%s1158_s1 + $0x250] sm:$0xff]  ;;  %v249_v54 = vpack.c.bf16 %v122_v42, %v121_v39 }
  0x1b   :  { %344 = vmatpush.bf16.msra.mxu3 %v237_v10  ;;  %v138_v48 = vld [vmem:[%s1158_s1 + $0x2e8] sm:$0xff]  ;;  %v169_v49 = vld [vmem:[%s1158_s1 + $0x3e0] sm:$0xff]  ;;  %v120_v53 = vld [vmem:[%s1158_s1 + $0x258] sm:$0xff]  ;;  %v265_v58 = vpack.c.bf16 %v154_v44, %v153_v43 }
  0x1c   :  { %303 = vmatpush.bf16.msra.mxu0 %v212_v16  ;;  %v170_v51 = vld [vmem:[%s1158_s1 + $0x3e8] sm:$0xff]  ;;  %v25_v55 = vld [vmem:[%s1157_s0] sm:$0xff]  ;;  %v35_v56 = vld [vmem:[%s1157_s0 + $0x50] sm:$0x1]  ;;  %v257_v63 = vpack.c.bf16 %v138_v48, %v137_v47  ;;  %v248_v8 = vpack.c.bf16 %v120_v53, %v119_v52 }
  0x1d   :  { %331 = vmatpush.bf16.msra.mxu2 %v228_v19  ;;  %v27_v57 = vld [vmem:[%s1157_s0 + $0x10] sm:$0xff]  ;;  %v152_v60 = vld [vmem:[%s1158_s1 + $0x358] sm:$0xff]  ;;  %v201_v61 = vpack.c.bf16 %v35_v56, %v25_v55  ;;  %v37_v62 = vld [vmem:[%s1157_s0 + $0x60] sm:$0x1]  ;;  %v273_v4 = vpack.c.bf16 %v170_v51, %v169_v49 }
  0x1e   :  { %317 = vmatpush.bf16.msra.mxu1 %v220_v20  ;;  %v151_v59 = vld [vmem:[%s1158_s1 + $0x350] sm:$0xff]  ;;  %v136_v1 = vld [vmem:[%s1158_s1 + $0x2d8] sm:$0xff]  ;;  %v203_v2 = vpack.c.bf16 %v37_v62, %v27_v57  ;;  %v26_v3 = vld [vmem:[%s1157_s0 + $0x8] sm:$0xff] }
  0x1f   :  { %345 = vmatpush.bf16.msra.mxu3 %v236_v24  ;;  %v135_v0 = vld [vmem:[%s1158_s1 + $0x2d0] sm:$0xff]  ;;  %v36_v5 = vld [vmem:[%s1157_s0 + $0x58] sm:$0x1]  ;;  %v38_v7 = vld [vmem:[%s1157_s0 + $0x68] sm:$0x1]  ;;  %v264_v13 = vpack.c.bf16 %v152_v60, %v151_v59 }
  0x20   :  { %304 = vmatpush.bf16.msra.mxu0 %v211_v31  ;;  %v28_v6 = vld [vmem:[%s1157_s0 + $0x18] sm:$0xff]  ;;  %v167_v9 = vld [vmem:[%s1158_s1 + $0x3d0] sm:$0xff]  ;;  %v202_v11 = vpack.c.bf16 %v36_v5, %v26_v3  ;;  %v117_v14 = vld [vmem:[%s1158_s1 + $0x240] sm:$0xff]  ;;  %v256_v16 = vpack.c.bf16 %v136_v1, %v135_v0 }
  0x21   :  { %332 = vmatpush.bf16.msra.mxu2 %v227_v35  ;;  %v168_v10 = vld [vmem:[%s1158_s1 + $0x3d8] sm:$0xff]  ;;  %v204_v12 = vpack.c.bf16 %v38_v7, %v28_v6  ;;  %v118_v15 = vld [vmem:[%s1158_s1 + $0x248] sm:$0xff]  ;;  %v149_v17 = vld [vmem:[%s1158_s1 + $0x340] sm:$0xff] }
  0x22   :  { %318 = vmatpush.bf16.msra.mxu1 %v219_v41  ;;  %v150_v18 = vld [vmem:[%s1158_s1 + $0x348] sm:$0xff]  ;;  %v272_v19 = vpack.c.bf16 %v168_v10, %v167_v9  ;;  %v133_v20 = vld [vmem:[%s1158_s1 + $0x2c0] sm:$0xff]  ;;  %v247_v22 = vpack.c.bf16 %v118_v15, %v117_v14  ;;  %v115_v26 = vld [vmem:[%s1158_s1 + $0x230] sm:$0xff] }
  0x23   :  { %346 = vmatpush.bf16.msra.mxu3 %v235_v45  ;;  %305 = vmatmul.bf16.vlgmr.msra.gmra.mxu0 %v201_v61  ;;  %v134_v21 = vld [vmem:[%s1158_s1 + $0x2c8] sm:$0xff]  ;;  %v165_v23 = vld [vmem:[%s1158_s1 + $0x3c0] sm:$0xff]  ;;  %v263_v25 = vpack.c.bf16 %v150_v18, %v149_v17  ;;  %v116_v27 = vld [vmem:[%s1158_s1 + $0x238] sm:$0xff] }
  0x24   :  { %353 = vmatpush.bf16.msrb.mxu0 %v250_v36  ;;  %333 = vmatmul.bf16.vlgmr.msra.gmra.mxu2 %v203_v2  ;;  %v166_v24 = vld [vmem:[%s1158_s1 + $0x3c8] sm:$0xff]  ;;  %v255_v28 = vpack.c.bf16 %v134_v21, %v133_v20  ;;  %v147_v29 = vld [vmem:[%s1158_s1 + $0x330] sm:$0xff]  ;;  %v148_v30 = vld [vmem:[%s1158_s1 + $0x338] sm:$0xff]  ;;  %v246_v34 = vpack.c.bf16 %v116_v27, %v115_v26 }
  0x25   :  { %381 = vmatpush.bf16.msrb.mxu2 %v266_v40  ;;  %319 = vmatmul.bf16.vlgmr.msra.gmra.mxu1 %v202_v11  ;;  %v271_v31 = vpack.c.bf16 %v166_v24, %v165_v23  ;;  %v131_v32 = vld [vmem:[%s1158_s1 + $0x2b0] sm:$0xff]  ;;  %v132_v33 = vld [vmem:[%s1158_s1 + $0x2b8] sm:$0xff]  ;;  %v262_v37 = vpack.c.bf16 %v148_v30, %v147_v29  ;;  %v113_v38 = vld [vmem:[%s1158_s1 + $0x220] sm:$0xff] }
  0x26   :  { %367 = vmatpush.bf16.msrb.mxu1 %v258_v46  ;;  %347 = vmatmul.bf16.vlgmr.msra.gmra.mxu3 %v204_v12  ;;  %v163_v35 = vld [vmem:[%s1158_s1 + $0x3b0] sm:$0xff]  ;;  %v164_v36 = vld [vmem:[%s1158_s1 + $0x3b8] sm:$0xff]  ;;  %v114_v39 = vld [vmem:[%s1158_s1 + $0x228] sm:$0xff]  ;;  %v254_v40 = vpack.c.bf16 %v132_v33, %v131_v32 }
  0x27   :  { %395 = vmatpush.bf16.msrb.mxu3 %v274_v50  ;;  %v145_v41 = vld [vmem:[%s1158_s1 + $0x320] sm:$0xff]  ;;  %v146_v42 = vld [vmem:[%s1158_s1 + $0x328] sm:$0xff]  ;;  %v270_v43 = vpack.c.bf16 %v164_v36, %v163_v35  ;;  %v245_v46 = vpack.c.bf16 %v114_v39, %v113_v38  ;;  %v111_v49 = vld [vmem:[%s1158_s1 + $0x210] sm:$0xff] }
  0x28   :  { %354 = vmatpush.bf16.msrb.mxu0 %v249_v54  ;;  %v129_v44 = vld [vmem:[%s1158_s1 + $0x2a0] sm:$0xff]  ;;  %v130_v45 = vld [vmem:[%s1158_s1 + $0x2a8] sm:$0xff]  ;;  %v261_v50 = vpack.c.bf16 %v146_v42, %v145_v41  ;;  %v112_v51 = vld [vmem:[%s1158_s1 + $0x218] sm:$0xff] }
  0x29   :  { %382 = vmatpush.bf16.msrb.mxu2 %v265_v58  ;;  %v161_v47 = vld [vmem:[%s1158_s1 + $0x3a0] sm:$0xff]  ;;  %v162_v48 = vld [vmem:[%s1158_s1 + $0x3a8] sm:$0xff]  ;;  %v143_v52 = vld [vmem:[%s1158_s1 + $0x310] sm:$0xff]  ;;  %v253_v54 = vpack.c.bf16 %v130_v45, %v129_v44  ;;  %v244_v62 = vpack.c.bf16 %v112_v51, %v111_v49 }
  0x2a   :  { %368 = vmatpush.bf16.msrb.mxu1 %v257_v63  ;;  %v144_v53 = vld [vmem:[%s1158_s1 + $0x318] sm:$0xff]  ;;  %v127_v55 = vld [vmem:[%s1158_s1 + $0x290] sm:$0xff]  ;;  %v269_v58 = vpack.c.bf16 %v162_v48, %v161_v47  ;;  %v109_v60 = vld [vmem:[%s1158_s1 + $0x200] sm:$0xff] }
  0x2b   :  { %396 = vmatpush.bf16.msrb.mxu3 %v273_v4  ;;  %v128_v56 = vld [vmem:[%s1158_s1 + $0x298] sm:$0xff]  ;;  %v159_v57 = vld [vmem:[%s1158_s1 + $0x390] sm:$0xff]  ;;  %v110_v61 = vld [vmem:[%s1158_s1 + $0x208] sm:$0xff]  ;;  %v260_v2 = vpack.c.bf16 %v144_v53, %v143_v52 }
  0x2c   :  { %355 = vmatpush.bf16.msrb.mxu0 %v248_v8  ;;  %v160_v59 = vld [vmem:[%s1158_s1 + $0x398] sm:$0xff]  ;;  %v141_v63 = vld [vmem:[%s1158_s1 + $0x300] sm:$0xff]  ;;  %v142_v0 = vld [vmem:[%s1158_s1 + $0x308] sm:$0xff]  ;;  %v252_v6 = vpack.c.bf16 %v128_v56, %v127_v55  ;;  %v243_v14 = vpack.c.bf16 %v110_v61, %v109_v60 }
  0x2d   :  { %383 = vmatpush.bf16.msrb.mxu2 %v264_v13  ;;  %v187_v1 = vld [vmem:[%s1158_s1 + $0x470] sm:$0xff]  ;;  %v188_v3 = vld [vmem:[%s1158_s1 + $0x478] sm:$0xff]  ;;  %v125_v4 = vld [vmem:[%s1158_s1 + $0x280] sm:$0xff]  ;;  %v268_v10 = vpack.c.bf16 %v160_v59, %v159_v57  ;;  %v259_v18 = vpack.c.bf16 %v142_v0, %v141_v63 }
  0x2e   :  { %369 = vmatpush.bf16.msrb.mxu1 %v256_v16  ;;  %v126_v5 = vld [vmem:[%s1158_s1 + $0x288] sm:$0xff]  ;;  %v157_v7 = vld [vmem:[%s1158_s1 + $0x380] sm:$0xff]  ;;  %v39_v11 = vld [vmem:[%s1157_s0 + $0x70] sm:$0x1] }
  0x2f   :  { %397 = vmatpush.bf16.msrb.mxu3 %v272_v19  ;;  %v158_v8 = vld [vmem:[%s1158_s1 + $0x388] sm:$0xff]  ;;  %v29_v9 = vld [vmem:[%s1157_s0 + $0x20] sm:$0xff]  ;;  %v31_v12 = vld [vmem:[%s1157_s0 + $0x30] sm:$0xff]  ;;  %v282_v19 = vpack.c.bf16 %v188_v3, %v187_v1  ;;  %v251_v23 = vpack.c.bf16 %v126_v5, %v125_v4 }
  0x30   :  { %356 = vmatpush.bf16.msrb.mxu0 %v247_v22  ;;  %v41_v13 = vld [vmem:[%s1157_s0 + $0x80] sm:$0x1]  ;;  %v199_v15 = vld [vmem:[%s1158_s1 + $0x4d0] sm:$0xff]  ;;  %v200_v16 = vld [vmem:[%s1158_s1 + $0x4d8] sm:$0xff]  ;;  %v267_v26 = vpack.c.bf16 %v158_v8, %v157_v7  ;;  %v205_v27 = vpack.c.bf16 %v39_v11, %v29_v9 }
  0x31   :  { %384 = vmatpush.bf16.msrb.mxu2 %v263_v25  ;;  %v30_v17 = vld [vmem:[%s1157_s0 + $0x28] sm:$0xff]  ;;  %v40_v20 = vld [vmem:[%s1157_s0 + $0x78] sm:$0x1]  ;;  %v185_v24 = vld [vmem:[%s1158_s1 + $0x460] sm:$0xff] }
  0x32   :  { %370 = vmatpush.bf16.msrb.mxu1 %v255_v28  ;;  %v32_v21 = vld [vmem:[%s1157_s0 + $0x38] sm:$0xff]  ;;  %v42_v22 = vld [vmem:[%s1157_s0 + $0x88] sm:$0x1] }
  0x33   :  { %398 = vmatpush.bf16.msrb.mxu3 %v271_v31  ;;  %v186_v25 = vld [vmem:[%s1158_s1 + $0x468] sm:$0xff] }
  0x34   :  { %357 = vmatpush.bf16.msrb.mxu0 %v246_v34 }
  0x35   :  { %385 = vmatpush.bf16.msrb.mxu2 %v262_v37 }
  0x36   :  { %371 = vmatpush.bf16.msrb.mxu1 %v254_v40 }
  0x37   :  { %399 = vmatpush.bf16.msrb.mxu3 %v270_v43 }
  0x38   :  { %358 = vmatpush.bf16.msrb.mxu0 %v245_v46 }
  0x39   :  { %386 = vmatpush.bf16.msrb.mxu2 %v261_v50 }
  0x3a   :  { %372 = vmatpush.bf16.msrb.mxu1 %v253_v54 }
  0x3b   :  { %400 = vmatpush.bf16.msrb.mxu3 %v269_v58 }
  0x3c   :  { %359 = vmatpush.bf16.msrb.mxu0 %v244_v62 }
  0x3d   :  { %387 = vmatpush.bf16.msrb.mxu2 %v260_v2 }
  0x3e   :  { %373 = vmatpush.bf16.msrb.mxu1 %v252_v6 }
  0x3f   :  { %401 = vmatpush.bf16.msrb.mxu3 %v268_v10 }
  0x40   :  { %11 = vsyncpa [#allocation3], 0  ;;  %360 = vmatpush.bf16.msrb.mxu0 %v243_v14  ;;  %v207_v28 = vpack.c.bf16 %v41_v13, %v31_v12  ;;  %v288_v29 = vpack.c.bf16 %v200_v16, %v199_v15  ;;  %v206_v30 = vpack.c.bf16 %v40_v20, %v30_v17  ;;  %v281_v31 = vpack.c.bf16 %v186_v25, %v185_v24  ;;  %v197_v32 = vld [vmem:[%s1158_s1 + $0x4c0] sm:$0xff]  ;;  %v198_v33 = vld [vmem:[%s1158_s1 + $0x4c8] sm:$0xff]  ;;  %s514_s20 = sshll.u32 %s1163_s6, 4  ;;  %s568_s23 = smov 128   ;;  %s515_s20 = int_to_ptr.hbm [resolvable:$true] %s514_s20 }
  0x41   :  { %388 = vmatpush.bf16.msrb.mxu2 %v259_v18  ;;  %v208_v34 = vpack.c.bf16 %v42_v22, %v32_v21  ;;  %v183_v35 = vld [vmem:[%s1158_s1 + $0x450] sm:$0xff]  ;;  %v184_v36 = vld [vmem:[%s1158_s1 + $0x458] sm:$0xff]  ;;  %v287_v37 = vpack.c.bf16 %v198_v33, %v197_v32  ;;  %v181_v41 = vld [vmem:[%s1158_s1 + $0x440] sm:$0xff]  ;;  %vm293_vm0 = vcmask 785408   ;;  %vm439_vm1 = vcmask 523264   ;;  %s569_s24 = smov 8  }
  0x42   :  { %374 = vmatpush.bf16.msrb.mxu1 %v251_v23  ;;  %v280_v38 = vpack.c.bf16 %v184_v36, %v183_v35  ;;  %v195_v39 = vld [vmem:[%s1158_s1 + $0x4b0] sm:$0xff]  ;;  %v196_v40 = vld [vmem:[%s1158_s1 + $0x4b8] sm:$0xff]  ;;  %v182_v42 = vld [vmem:[%s1158_s1 + $0x448] sm:$0xff]  ;;  %vm443_vm2 = vcmask 516096  }
  0x43   :  { %402 = vmatpush.bf16.msrb.mxu3 %v267_v26  ;;  %361 = vmatmul.bf16.vlgmr.msrb.gmra.mxu0 %v205_v27  ;;  %v286_v43 = vpack.c.bf16 %v196_v40, %v195_v39  ;;  %v279_v44 = vpack.c.bf16 %v182_v42, %v181_v41  ;;  %v193_v45 = vld [vmem:[%s1158_s1 + $0x4a0] sm:$0xff]  ;;  %v194_v46 = vld [vmem:[%s1158_s1 + $0x4a8] sm:$0xff]  ;;  %v179_v47 = vld [vmem:[%s1158_s1 + $0x430] sm:$0xff] }
  0x44   :  { %409 = vmatpush.bf16.msra.mxu0 %v282_v19  ;;  %389 = vmatmul.bf16.vlgmr.msrb.gmra.mxu2 %v207_v28  ;;  %v180_v48 = vld [vmem:[%s1158_s1 + $0x438] sm:$0xff]  ;;  %v285_v49 = vpack.c.bf16 %v194_v46, %v193_v45  ;;  %v191_v51 = vld [vmem:[%s1158_s1 + $0x490] sm:$0xff]  ;;  %v177_v53 = vld [vmem:[%s1158_s1 + $0x420] sm:$0xff] }
  0x45   :  { %375 = vmatmul.bf16.vlgmr.msrb.gmra.mxu1 %v206_v30  ;;  %v278_v50 = vpack.c.bf16 %v180_v48, %v179_v47  ;;  %v192_v52 = vld [vmem:[%s1158_s1 + $0x498] sm:$0xff]  ;;  %v178_v54 = vld [vmem:[%s1158_s1 + $0x428] sm:$0xff]  ;;  %v189_v57 = vld [vmem:[%s1158_s1 + $0x480] sm:$0xff] }
  0x46   :  { %425 = vmatpush.bf16.msra.mxu1 %v288_v29  ;;  %403 = vmatmul.bf16.vlgmr.msrb.gmra.mxu3 %v208_v34  ;;  %v284_v55 = vpack.c.bf16 %v192_v52, %v191_v51  ;;  %v277_v56 = vpack.c.bf16 %v178_v54, %v177_v53  ;;  %v190_v58 = vld [vmem:[%s1158_s1 + $0x488] sm:$0xff]  ;;  %v175_v59 = vld [vmem:[%s1158_s1 + $0x410] sm:$0xff]  ;;  %v176_v60 = vld [vmem:[%s1158_s1 + $0x418] sm:$0xff]  ;;  %v566_v51 = vmov 64.0  }
  0x47   :  { %v283_v61 = vpack.c.bf16 %v190_v58, %v189_v57  ;;  %v34_v62 = vld [vmem:[%s1157_s0 + $0x48] sm:$0xff]  ;;  %v44_v63 = vld [vmem:[%s1157_s0 + $0x98] sm:$0x1]  ;;  %v276_v0 = vpack.c.bf16 %v176_v60, %v175_v59  ;;  %v173_v1 = vld [vmem:[%s1158_s1 + $0x400] sm:$0xff]  ;;  %534 = vrcp.f32 %v566_v51 }
  0x48   :  { %410 = vmatpush.bf16.msra.mxu0 %v281_v31  ;;  %v174_v2 = vld [vmem:[%s1158_s1 + $0x408] sm:$0xff]  ;;  %v210_v3 = vpack.c.bf16 %v44_v63, %v34_v62  ;;  %v33_v5 = vld [vmem:[%s1157_s0 + $0x40] sm:$0xff]  ;;  %v43_v6 = vld [vmem:[%s1157_s0 + $0x90] sm:$0x1] }
  0x49   :  { %v275_v4 = vpack.c.bf16 %v174_v2, %v173_v1  ;;  %v209_v7 = vpack.c.bf16 %v43_v6, %v33_v5  ;;  %v531_v10 = vld [vmem:[%s1159_s2] ss:$0 sm:$0xff] }
  0x4a   :  { %426 = vmatpush.bf16.msra.mxu1 %v287_v37 }
  0x4c   :  { %411 = vmatpush.bf16.msra.mxu0 %v280_v38 }
  0x4d   :  { %v535_v52 = vpop.eup %534 }
  0x4e   :  { %427 = vmatpush.bf16.msra.mxu1 %v286_v43  ;;  %v448_v53 = vmul.f32 64.0, %v535_v52  ;;  %vm452_vm3 = vweird.f32 %v535_v52 }
  0x50   :  { %412 = vmatpush.bf16.msra.mxu0 %v279_v44  ;;  %v449_v54 = vsub.f32 1.0, %v448_v53 }
  0x52   :  { %428 = vmatpush.bf16.msra.mxu1 %v285_v49 }
  0x54   :  { %413 = vmatpush.bf16.msra.mxu0 %v278_v50 }
  0x56   :  { %429 = vmatpush.bf16.msra.mxu1 %v284_v55  ;;  %v450_v55 = vmul.f32 %v535_v52, %v449_v54 }
  0x58   :  { %414 = vmatpush.bf16.msra.mxu0 %v277_v56  ;;  %v451_v56 = vadd.f32 %v535_v52, %v450_v55 }
  0x5a   :  { %430 = vmatpush.bf16.msra.mxu1 %v283_v61  ;;  %v453_v57 = vsel %vm452_vm3, %v535_v52, %v451_v56 }
  0x5c   :  { %415 = vmatpush.bf16.msra.mxu0 %v276_v0 }
  0x5d   :  { %526 = vmatmul.msk.bf16.vlgmr.msra.gmra.mxu1 %vm293_vm0, %v210_v3 }
  0x60   :  { %416 = vmatpush.bf16.msra.mxu0 %v275_v4 }
  0x63   :  { %417 = vmatmul.bf16.vlgmr.msra.gmra.mxu0 %v209_v7 }
  0xa0   :  { %v306_v8 = vpop.f32.mrf.mxu0 }
  0xa1   :  { %v307_v12 = vadd.f32 %v531_v10, %v306_v8 }
  0xa2   :  { %v320_v9 = vpop.f32.mrf.mxu1 }
  0xa3   :  { %v321_v16 = vadd.f32 %v320_v9, %v307_v12 }
  0xa7   :  { %v334_v11 = vpop.f32.mrf.mxu2 }
  0xa8   :  { %v308_v13 = vpop.f32.mrf.mxu0  ;;  %v335_v17 = vadd.f32 %v334_v11, %v321_v16 }
  0xa9   :  { %v348_v15 = vpop.f32.mrf.mxu3  ;;  %v309_v21 = vadd.f32 %v531_v10, %v308_v13 }
  0xaa   :  { %v322_v14 = vpop.f32.mrf.mxu1  ;;  %v349_v22 = vadd.f32 %v348_v15, %v335_v17 }
  0xab   :  { %v323_v24 = vadd.f32 %v322_v14, %v309_v21  ;;  %v533_v21 = vld [vmem:[%s1161_s4] ss:$0 sm:$0xff] }
  0xaf   :  { %v336_v18 = vpop.f32.mrf.mxu2 }
  0xb0   :  { %v337_v27 = vadd.f32 %v336_v18, %v323_v24  ;;  %v532_v18 = vld [vmem:[%s1160_s3] ss:$0 sm:$0xff]  ;;  %s567_s3 = smov [#allocation2]  }
  0xb1   :  { %v350_v23 = vpop.f32.mrf.mxu3  ;;  %s512_s4 = sshll.u32 %s567_s3, 4  ;;  %s513_s4 = int_to_ptr.vmem [resolvable:$true] %s512_s4 }
  0xb2   :  { %v351_v32 = vadd.f32 %v350_v23, %v337_v27 }
  0xc0   :  { %v362_v19 = vpop.f32.mrf.mxu0 }
  0xc1   :  { %v363_v25 = vadd.f32 %v362_v19, %v349_v22 }
  0xc2   :  { %v376_v20 = vpop.f32.mrf.mxu1 }
  0xc3   :  { %v377_v28 = vadd.f32 %v376_v20, %v363_v25 }
  0xc7   :  { %v390_v26 = vpop.f32.mrf.mxu2 }
  0xc8   :  { %v364_v29 = vpop.f32.mrf.mxu0  ;;  %v391_v33 = vadd.f32 %v390_v26, %v377_v28  ;;  %v502_v26 = vld [vmem:[%s1162_s5] sm:$0xff] }
  0xc9   :  { %v404_v31 = vpop.f32.mrf.mxu3  ;;  %v365_v34 = vadd.f32 %v364_v29, %v351_v32 }
  0xca   :  { %v378_v30 = vpop.f32.mrf.mxu1  ;;  %v405_v35 = vadd.f32 %v404_v31, %v391_v33  ;;  %v503_v33 = vld [vmem:[%s1162_s5 + $0x8] sm:$0x1] }
  0xcb   :  { %v379_v39 = vadd.f32 %v378_v30, %v365_v34 }
  0xcf   :  { %v392_v36 = vpop.f32.mrf.mxu2 }
  0xd0   :  { %v393_v41 = vadd.f32 %v392_v36, %v379_v39 }
  0xd1   :  { %v406_v43 = vpop.f32.mrf.mxu3 }
  0xd2   :  { %v407_v45 = vadd.f32 %v406_v43, %v393_v41 }
  0xda   :  { %v432_v37 = vpop.f32.mrf.mxu1 }
  0xe0   :  { %v418_v38 = vpop.f32.mrf.mxu0 }
  0xe1   :  { %v419_v40 = vadd.f32 %v418_v38, %v405_v35 }
  0xe2   :  { %v434_v48 = vpop.f32.mrf.mxu1 }
  0xe3   :  { %v433_v42 = vadd.f32 %v432_v37, %v419_v40 }
  0xe5   :  { %v440_v44 = vsel %vm439_vm1, %v433_v42, 0.0 }
  0xe6   :  { %441 = vadd.xlane.f32.xlu0 %v440_v44 }
  0xe8   :  { %v420_v46 = vpop.f32.mrf.mxu0 }
  0xe9   :  { %v421_v47 = vadd.f32 %v420_v46, %v407_v45 }
  0xeb   :  { %v435_v49 = vadd.f32 %v434_v48, %v421_v47 }
  0xed   :  { %v444_v50 = vsel %vm443_vm2, %v435_v49, 0.0 }
  0xee   :  { %445 = vadd.xlane.f32.xlu0 %v444_v50 }
 0x159   :  { %v442_v58 = vpop.xlane.xlu0 %441 }
 0x15a   :  { %v454_v59 = vmul.f32 %v453_v57, %v442_v58 }
 0x15c   :  { %v456_v60 = vsub.f32 %v433_v42, %v454_v59 }
 0x15e   :  { %v458_v61 = vmul.f32 %v456_v60, %v456_v60 }
 0x160   :  { %v460_v62 = vsel %vm439_vm1, %v458_v61, 0.0 }
 0x161   :  { %461 = vadd.xlane.f32.xlu1 %v460_v62  ;;  %v446_v63 = vpop.xlane.xlu0 %445 }
 0x162   :  { %v455_v0 = vmul.f32 %v453_v57, %v446_v63 }
 0x164   :  { %v457_v1 = vsub.f32 %v435_v49, %v455_v0 }
 0x166   :  { %v459_v2 = vmul.f32 %v457_v1, %v457_v1 }
 0x168   :  { %v463_v3 = vsel %vm443_vm2, %v459_v2, 0.0 }
 0x169   :  { %464 = vadd.xlane.f32.xlu1 %v463_v3 }
 0x1d4   :  { %v462_v4 = vpop.xlane.xlu1 %461 }
 0x1d5   :  { %v466_v5 = vmul.f32 %v462_v4, %v453_v57 }
 0x1d7   :  { %v468_v6 = vadd.f32 1e-05, %v466_v5 }
 0x1d9   :  { %536 = vrsqrt.f32 %v468_v6  ;;  %vm476_vm5 = vweird.f32 %v468_v6 }
 0x1dc   :  { %v465_v7 = vpop.xlane.xlu1 %464 }
 0x1dd   :  { %v467_v8 = vmul.f32 %v465_v7, %v453_v57 }
 0x1df   :  { %v537_v9 = vpop.eup %536  ;;  %v469_v10 = vadd.f32 1e-05, %v467_v8 }
 0x1e0   :  { %v471_v11 = vmul.f32 %v537_v9, %v468_v6  ;;  %vm477_vm4 = vweird.f32 %v537_v9 }
 0x1e1   :  { %538 = vrsqrt.f32 %v469_v10  ;;  %vm478_vm6 = vmor %vm476_vm5, %vm477_vm4  ;;  %vm486_vm8 = vweird.f32 %v469_v10 }
 0x1e2   :  { %v472_v12 = vmul.f32 %v537_v9, %v471_v11 }
 0x1e4   :  { %v473_v13 = vmul.f32 0.5, %v472_v12 }
 0x1e6   :  { %v474_v14 = vsub.f32 1.5, %v473_v13 }
 0x1e7   :  { %v539_v15 = vpop.eup %538 }
 0x1e8   :  { %v475_v16 = vmul.f32 %v537_v9, %v474_v14  ;;  %v481_v17 = vmul.f32 %v539_v15, %v469_v10  ;;  %vm487_vm7 = vweird.f32 %v539_v15 }
 0x1e9   :  { %vm488_vm9 = vmor %vm486_vm8, %vm487_vm7 }
 0x1ea   :  { %v479_v19 = vsel %vm478_vm6, %v537_v9, %v475_v16  ;;  %v482_v20 = vmul.f32 %v539_v15, %v481_v17 }
 0x1eb   :  { %v490_v22 = vmul.f32 %v479_v19, %v456_v60 }
 0x1ec   :  { %v483_v23 = vmul.f32 0.5, %v482_v20 }
 0x1ed   :  { %v495_v24 = vmul.f32 %v532_v18, %v490_v22 }
 0x1ee   :  { %v484_v25 = vsub.f32 1.5, %v483_v23 }
 0x1ef   :  { %v500_v27 = vadd.f32 %v533_v21, %v495_v24 }
 0x1f0   :  { %v485_v28 = vmul.f32 %v539_v15, %v484_v25 }
 0x1f1   :  { %v504_v29 = vadd.f32 %v502_v26, %v500_v27 }
 0x1f2   :  { %v489_v30 = vsel %vm488_vm9, %v539_v15, %v485_v28 }
 0x1f3   :  { %v491_v31 = vmul.f32 %v489_v30, %v457_v1  ;;  %506 = vst.msk [vmem:[#allocation2] sm:$0xff] %vm439_vm1, %v504_v29 }
 0x1f5   :  { %v496_v32 = vmul.f32 %v532_v18, %v491_v31 }
 0x1f7   :  { %v501_v34 = vadd.f32 %v533_v21, %v496_v32 }
 0x1f9   :  { %v505_v35 = vadd.f32 %v503_v33, %v501_v34 }
 0x1fb   :  { %507 = vst.msk [vmem:[#allocation2 + $0x8] sm:$0x1] %vm443_vm2, %v505_v35 }
 0x1fc   :  { %520 = dma.vmem_to_hbm [thread:$0]  %s513_s4, 256, %s515_s20, [#allocation3], %s568_s23, %s568_s23, %s569_s24  }
 0x1fd   :  { %564 = dma.done.wait [#allocation3], 256  }
 0x1fe   :  { %565 = vsyncadd [#allocation3], 4294967040 }
 0x1ff   :  { %525 = vsyncpa [#allocation3], 1 }

</bundles_post_ra>
